<compile_context>
chip_gen: v6e
topology: v6e:2x2x1
jax: 0.10.0
libtpu: 0.0.40
codegen_flags: <defaults>
</compile_context>

<pallas_src>
import functools

import jax
import jax.numpy as jnp
from jax.experimental import pallas as pl
from jax.experimental.pallas import tpu as pltpu


def _node_drop_kernel(seed_ref, thresh_ref, x_ref, o_ref):
    """seed_ref (int32[1]) / thresh_ref (int32[1], keep_rate*2^24) in SMEM;
    x_ref/o_ref are (TILE_N, D) VMEM tiles."""
    tile_n = x_ref.shape[0]
    base = pl.program_id(0) * tile_n

    # Global node index per row of this tile, shape (TILE_N, 1).
    idx = jax.lax.broadcasted_iota(jnp.int32, (tile_n, 1), 0) + base

    # Seed mix is a scalar (computed once per tile on the scalar unit).
    seed_mix = seed_ref[0].astype(jnp.uint32) * jnp.uint32(0x9E3779B9)

    # Counter-based PRNG: 2-round multiplicative hash of (node_index + seed_mix).
    # Deterministic per node regardless of tiling; only (TILE_N, 1) lanes of work.
    x = idx.astype(jnp.uint32) + seed_mix
    x = x * jnp.uint32(0x7FEB352D)
    x = x ^ (x >> 15)
    x = x * jnp.uint32(0x846CA68B)
    x = x ^ (x >> 13)

    # Keep node iff top-24-bit uniform < keep_rate * 2^24 (integer-domain compare:
    # no int->float convert, no fmul; identical in distribution to
    # floor(u + keep_rate) == 1).
    keep = (x >> 8).astype(jnp.int32) < thresh_ref[0]            # (TILE_N, 1) bool

    # Broadcasted multiply over the embed (lane) dim: 1 vmul per data vreg,
    # keeps sub-32-bit dtypes packed.
    o_ref[...] = x_ref[...] * keep.astype(x_ref.dtype)


@functools.partial(jax.jit, static_argnames=("tile_n",))
def _node_drop_call(embeds, seed, keep_rate, tile_n):
    n, d = embeds.shape
    seed_arr = jnp.asarray(seed, dtype=jnp.int32).reshape((1,))
    keep = jnp.asarray(keep_rate, dtype=jnp.float32)
    thresh_arr = (
        jnp.clip(jnp.floor(keep * jnp.float32(1 << 24)), 0.0, float(1 << 24))
        .astype(jnp.int32)
        .reshape((1,))
    )

    grid = (pl.cdiv(n, tile_n),)
    return pl.pallas_call(
        _node_drop_kernel,
        out_shape=jax.ShapeDtypeStruct((n, d), embeds.dtype),
        grid=grid,
        in_specs=[
            pl.BlockSpec(memory_space=pltpu.MemorySpace.SMEM),       # seed
            pl.BlockSpec(memory_space=pltpu.MemorySpace.SMEM),       # int threshold
            pl.BlockSpec((tile_n, d), lambda i: (i, 0)),             # embeds tile
        ],
        out_specs=pl.BlockSpec((tile_n, d), lambda i: (i, 0)),       # lane-dense output
        compiler_params=pltpu.CompilerParams(
            dimension_semantics=("parallel",),                       # shard grid across TCs
            vmem_limit_bytes=48 * 1024 * 1024,                       # 32 MiB buffers + headroom
        ),
    )(seed_arr, thresh_arr, embeds)


def _row_granule(dtype):
    """Sublane row granule: 8 rows for 4-byte, 16 for 2-byte, 32 for 1-byte dtypes."""
    itemsize = jnp.dtype(dtype).itemsize
    packing = max(1, 4 // itemsize)
    return 8 * packing


def _choose_tile_n(n, d, dtype):
    """Biggest node-tile with ~8 MiB footprint (2 in + 2 out buffers ~32 MiB)."""
    granule = _row_granule(dtype)
    bytes_per_row = max(1, d * jnp.dtype(dtype).itemsize)
    tile = min(n, max(granule, (8 * 1024 * 1024) // bytes_per_row))
    if tile < n:
        tile = max(granule, (tile // granule) * granule)
    return int(tile)


def _mask_keep(n, seed, keep_rate):
    """Reference/fallback mask: identical hash to the kernel (tiling-independent)."""
    idx = jnp.arange(n, dtype=jnp.uint32)
    seed_mix = jnp.asarray(seed, jnp.int32).astype(jnp.uint32) * jnp.uint32(0x9E3779B9)
    x = idx + seed_mix
    x = x * jnp.uint32(0x7FEB352D)
    x = x ^ (x >> 15)
    x = x * jnp.uint32(0x846CA68B)
    x = x ^ (x >> 13)
    keep = jnp.asarray(keep_rate, jnp.float32)
    thresh = jnp.clip(jnp.floor(keep * jnp.float32(1 << 24)), 0.0, float(1 << 24)).astype(jnp.int32)
    return (x >> 8).astype(jnp.int32) < thresh


@jax.jit
def _node_drop_jnp(embeds, seed, keep_rate):
    """Small-input fallback: plain jnp mask-multiply, fused by XLA."""
    n = embeds.shape[0]
    keep = _mask_keep(n, seed, keep_rate)
    return embeds * keep[:, None].astype(embeds.dtype)


def node_drop(embeds, keep_rate, seed=0, tile_n=None, use_pallas=None):
    """JAX/Pallas equivalent of NodeDrop.forward(embeds, keep_rate)."""
    # Early-out only for concrete Python numbers (same as the PyTorch module).
    # A traced keep_rate of 1.0 falls through; the integer threshold == 2^24
    # then keeps every node, so semantics still match.
    if isinstance(keep_rate, (int, float)) and float(keep_rate) == 1.0:
        return embeds

    n, d = embeds.shape
    if use_pallas is None:
        # Below ~256 KiB the pallas_call launch dominates; use the fused jnp path.
        use_pallas = n * d * jnp.dtype(embeds.dtype).itemsize >= 256 * 1024
    if not use_pallas:
        return _node_drop_jnp(embeds, seed, keep_rate)

    granule = _row_granule(embeds.dtype)
    if tile_n is None:
        tile_n = _choose_tile_n(n, d, embeds.dtype)
    else:
        tile_n = min(int(tile_n), n)
        if tile_n < n:
            tile_n = max(granule, (tile_n // granule) * granule)
    return _node_drop_call(embeds, seed, keep_rate, tile_n)


if __name__ == "__main__":
    # configs['data']: user_num=16, item_num=16 -> node_num=32; embed_dim=128.
    user_num, item_num, embed_dim = 16, 16, 128
    node_num = user_num + item_num

    key = jax.random.PRNGKey(0)
    embeds = jax.random.normal(key, (node_num, embed_dim), dtype=jnp.float32)

    # keep_rate < 1.0 -> Pallas kernel path (forced on, since this demo is tiny)
    out = jax.block_until_ready(node_drop(embeds, keep_rate=0.7, seed=42, use_pallas=True))
    row_zero = jnp.all(out == 0.0, axis=1)
    row_same = jnp.all(out == embeds, axis=1)
    assert bool(jnp.all(row_zero | row_same)), "each node must be kept or dropped whole"
    assert out.shape == embeds.shape and out.dtype == embeds.dtype

    # determinism for a fixed seed
    out2 = jax.block_until_ready(node_drop(embeds, keep_rate=0.7, seed=42, use_pallas=True))
    assert bool(jnp.all(out == out2))

    # Pallas path must match the jnp fallback exactly (same hash / threshold)
    out_jnp = jax.block_until_ready(node_drop(embeds, keep_rate=0.7, seed=42, use_pallas=False))
    assert bool(jnp.all(out == out_jnp)), "pallas and jnp paths must agree"

    # keep_rate == 1.0 -> identity path
    out_id = jax.block_until_ready(node_drop(embeds, keep_rate=1.0, seed=42))
    assert bool(jnp.all(out_id == embeds))

    # tiling consistency: multi-tile grid must give the same mask as a single tile
    embeds2 = jax.random.normal(jax.random.PRNGKey(1), (64, 128), dtype=jnp.float32)
    a = jax.block_until_ready(node_drop(embeds2, keep_rate=0.5, seed=7, use_pallas=True))
    b = jax.block_until_ready(node_drop(embeds2, keep_rate=0.5, seed=7, tile_n=8, use_pallas=True))
    assert bool(jnp.all(a == b)), "mask must be independent of node tiling"

    # larger graph: keep-fraction should be close to keep_rate
    embeds3 = jax.random.normal(jax.random.PRNGKey(2), (2048, 128), dtype=jnp.float32)
    out3 = jax.block_until_ready(node_drop(embeds3, keep_rate=0.7, seed=3))
    frac_kept = float(jnp.mean(jnp.any(out3 != 0.0, axis=1)))
    assert abs(frac_kept - 0.7) < 0.1, f"keep fraction {frac_kept} too far from 0.7"

    print("KERNEL_OK")
</pallas_src>

<mosaic_0001>
module attributes {stable_mosaic.version = 11 : i64} {
  func.func @_node_drop_kernel(%arg0: i32, %arg1: memref<1xi32, #tpu.memory_space<smem>>, %arg2: memref<1xi32, #tpu.memory_space<smem>>, %arg3: memref<32x128xf32, #tpu.memory_space<vmem>>, %arg4: memref<32x128xf32, #tpu.memory_space<vmem>>) attributes {dimension_semantics = [#tpu.dimension_semantics<parallel>], iteration_bounds = array<i64: 1>, scalar_prefetch = 0 : i64, scratch_operands = 0 : i64, tpu.core_type = #tpu.core_type<tc>, window_params = [{transform_indices = @transform_0, window_bounds = array<i64: 1>}, {transform_indices = @transform_1, window_bounds = array<i64: 1>}, {transform_indices = @transform_2, window_bounds = array<i64: 32, 128>}, {transform_indices = @transform_3, window_bounds = array<i64: 32, 128>}]} {
    %c32_i32 = arith.constant 32 : i32
    %0 = arith.muli %arg0, %c32_i32 : i32
    %1 = tpu.iota {dimensions = array<i32: 0>} : vector<32x1xi32>
    %2 = vector.broadcast %0 : i32 to vector<32x1xi32>
    %3 = arith.addi %1, %2 : vector<32x1xi32>
    %c0 = arith.constant 0 : index
    %4 = memref.load %arg1[%c0] : memref<1xi32, #tpu.memory_space<smem>>
    %c-1640531527_i32 = arith.constant -1640531527 : i32
    %5 = arith.muli %4, %c-1640531527_i32 : i32
    %6 = vector.broadcast %5 : i32 to vector<32x1xi32>
    %7 = arith.addi %3, %6 : vector<32x1xi32>
    %c2146121005_i32 = arith.constant 2146121005 : i32
    %8 = vector.broadcast %c2146121005_i32 : i32 to vector<32x1xi32>
    %9 = arith.muli %7, %8 : vector<32x1xi32>
    %c15_i32 = arith.constant 15 : i32
    %10 = vector.broadcast %c15_i32 : i32 to vector<32x1xi32>
    %11 = arith.shrui %9, %10 : vector<32x1xi32>
    %12 = arith.xori %9, %11 : vector<32x1xi32>
    %c-2073254261_i32 = arith.constant -2073254261 : i32
    %13 = vector.broadcast %c-2073254261_i32 : i32 to vector<32x1xi32>
    %14 = arith.muli %12, %13 : vector<32x1xi32>
    %c13_i32 = arith.constant 13 : i32
    %15 = vector.broadcast %c13_i32 : i32 to vector<32x1xi32>
    %16 = arith.shrui %14, %15 : vector<32x1xi32>
    %17 = arith.xori %14, %16 : vector<32x1xi32>
    %c8_i32 = arith.constant 8 : i32
    %18 = vector.broadcast %c8_i32 : i32 to vector<32x1xi32>
    %19 = arith.shrui %17, %18 : vector<32x1xi32>
    %c0_0 = arith.constant 0 : index
    %20 = memref.load %arg2[%c0_0] : memref<1xi32, #tpu.memory_space<smem>>
    %21 = vector.broadcast %20 : i32 to vector<32x1xi32>
    %22 = arith.cmpi slt, %19, %21 : vector<32x1xi32>
    %c0_1 = arith.constant 0 : index
    %c0_2 = arith.constant 0 : index
    %23 = vector.load %arg3[%c0_1, %c0_2] : memref<32x128xf32, #tpu.memory_space<vmem>>, vector<32x128xf32>
    %24 = arith.extui %22 : vector<32x1xi1> to vector<32x1xi32>
    %25 = arith.sitofp %24 : vector<32x1xi32> to vector<32x1xf32>
    %26 = vector.broadcast %25 : vector<32x1xf32> to vector<32x128xf32>
    %27 = arith.mulf %23, %26 : vector<32x128xf32>
    %c0_3 = arith.constant 0 : index
    %c0_4 = arith.constant 0 : index
    %28 = vector.load %arg4[%c0_3, %c0_4] : memref<32x128xf32, #tpu.memory_space<vmem>>, vector<32x128xf32>
    tpu.vector_store %arg4[%c0_3, %c0_4], %27 {strides = array<i32>} : memref<32x128xf32, #tpu.memory_space<vmem>>, vector<32x128xf32>,
    return
  }
  func.func @transform_0(%arg0: i32) -> i32 {
    %c0_i32 = arith.constant 0 : i32
    %c0_i32_0 = arith.constant 0 : i32
    return %c0_i32 : i32
  }
  func.func @transform_1(%arg0: i32) -> i32 {
    %c0_i32 = arith.constant 0 : i32
    %c0_i32_0 = arith.constant 0 : i32
    return %c0_i32 : i32
  }
  func.func @transform_2(%arg0: i32) -> (i32, i32) {
    %c0_i32 = arith.constant 0 : i32
    %c0_i32_0 = arith.constant 0 : i32
    return %arg0, %c0_i32 : i32, i32
  }
  func.func @transform_3(%arg0: i32) -> (i32, i32) {
    %c0_i32 = arith.constant 0 : i32
    %c0_i32_0 = arith.constant 0 : i32
    return %arg0, %c0_i32 : i32, i32
  }
}

</mosaic_0001>

<bundles_post_ra>
// kernel: _node_drop_call.1
= control target key start
LH: loop header
LB: loop body
LE: loop exit
PB: predicated region body
PF: predicated region fallthrough
CT: control target
= control target key end

     0   :  { %10 = vsyncpa [#allocation5], 0  ;;  %s216_s0 = inlined_call_operand.<no memory space> [shape: s32[1], index: 0, kind: input, shape index: {}]   ;;  %s217_s1 = inlined_call_operand.<no memory space> [shape: s32[1], index: 1, kind: input, shape index: {}]   ;;  %s218_s2 = inlined_call_operand.hbm [shape: f32[32,128], index: 2, kind: input, shape index: {}]   ;;  %s219_s3 = inlined_call_operand.hbm [shape: f32[32,128], index: 3, kind: output, shape index: {}]  }
   0x1   :  { %11 = vsyncpa [#allocation6], 0  ;;  %s173_s12 = smov [#allocation4]  }
   0x2   :  { %s21_s13 = sshll.u32 %s173_s12, 4  ;;  %s22_s13 = int_to_ptr.vmem [resolvable:$true] %s21_s13 }
   0x3   :  { %s137_s14 = scalar_lea.vmem %s22_s13, 512  ;;  %p142_p1 = scmp.lt.s32.totalorder %s22_s13, %s22_s13 }
   0x4   :  { %p138_p0 = scmp.ne.s32.totalorder %s22_s13, %s137_s14  ;;  %p143_p2 = scmp.lt.s32.totalorder %s137_s14, %s137_s14 }
   0x6   :  { %p144_p3 = por %p143_p2, %p142_p1 }
   0x8   :  { %p145_p4 = pnand %p144_p3, %p138_p0 }
   0xa   :  { %148 = shalt.err (!%p145_p4)
}
   0xb   :  { %s174_s15 = smov 128   ;;  %s175_s16 = smov 8  }
   0xc   :  { %27 = dma.hbm_to_vmem [thread:$0]  %s218_s2, 512, %s22_s13, [#allocation5], %s174_s15, %s174_s15, %s175_s16  }
   0xd   :  { %169 = dma.done.wait [#allocation5], 512  }
   0xe   :  { %170 = vsyncadd [#allocation5], 4294966784  ;;  %v32_v0 = vlaneseq  ;;  %s43_s21 = smul.u32 2654435769, %s216_s0  ;;  %v78_v30 = vstv %s217_s1  ;;  %v83_v35 = vld [vmem:[#allocation4] sm:$0xff]  ;;  %v176_v39 = vmov 0.0  }
   0xf   :  { %v84_v41 = vld [vmem:[#allocation4 + $0x8] sm:$0xff]  ;;  %v85_v42 = vld [vmem:[#allocation4 + $0x10] sm:$0xff]  ;;  %v86_v45 = vld [vmem:[#allocation4 + $0x18] sm:$0xff]  ;;  %s177_s22 = smov [#allocation7]  }
  0x10   :  { %v33_v1 = vshrl.u32 %v32_v0, 7  ;;  %v44_v2 = vstv %s43_s21  ;;  %s108_s1 = sshll.u32 %s177_s22, 4  ;;  %s109_s1 = int_to_ptr.vmem [resolvable:$true] %s108_s1 }
  0x11   :  { %s149_s23 = scalar_lea.vmem %s109_s1, 512  ;;  %p154_p6 = scmp.lt.s32.totalorder %s109_s1, %s109_s1 }
  0x12   :  { %v45_v3 = vadd.s32 %v44_v2, %v33_v1  ;;  %v34_v4 = vadd.s32 8, %v33_v1  ;;  %v35_v5 = vadd.s32 16, %v33_v1  ;;  %v36_v6 = vadd.s32 24, %v33_v1  ;;  %p150_p5 = scmp.ne.s32.totalorder %s109_s1, %s149_s23  ;;  %p155_p7 = scmp.lt.s32.totalorder %s149_s23, %s149_s23 }
  0x14   :  { %v49_v7 = vmul.u32 2146121005, %v45_v3  ;;  %v46_v8 = vadd.s32 %v44_v2, %v34_v4  ;;  %v47_v9 = vadd.s32 %v44_v2, %v35_v5  ;;  %v48_v10 = vadd.s32 %v44_v2, %v36_v6  ;;  %p156_p8 = por %p155_p7, %p154_p6 }
  0x16   :  { %v53_v11 = vshrl.u32 %v49_v7, 15  ;;  %v50_v12 = vmul.u32 2146121005, %v46_v8  ;;  %v51_v13 = vmul.u32 2146121005, %v47_v9  ;;  %p157_p9 = pnand %p156_p8, %p150_p5 }
  0x17   :  { %v52_v14 = vmul.u32 2146121005, %v48_v10 }
  0x18   :  { %v57_v15 = vxor.u32 %v53_v11, %v49_v7  ;;  %v54_v16 = vshrl.u32 %v50_v12, 15  ;;  %v55_v17 = vshrl.u32 %v51_v13, 15 }
  0x19   :  { %v56_v18 = vshrl.u32 %v52_v14, 15 }
  0x1a   :  { %v61_v19 = vmul.u32 2221713035, %v57_v15  ;;  %v58_v20 = vxor.u32 %v54_v16, %v50_v12  ;;  %v59_v21 = vxor.u32 %v55_v17, %v51_v13 }
  0x1b   :  { %v60_v22 = vxor.u32 %v56_v18, %v52_v14 }
  0x1c   :  { %v65_v23 = vshrl.u32 %v61_v19, 13  ;;  %v62_v24 = vmul.u32 2221713035, %v58_v20  ;;  %v63_v25 = vmul.u32 2221713035, %v59_v21 }
  0x1d   :  { %v64_v26 = vmul.u32 2221713035, %v60_v22 }
  0x1e   :  { %v69_v27 = vxor.u32 %v65_v23, %v61_v19  ;;  %v66_v28 = vshrl.u32 %v62_v24, 13  ;;  %v67_v29 = vshrl.u32 %v63_v25, 13 }
  0x1f   :  { %v68_v31 = vshrl.u32 %v64_v26, 13 }
  0x20   :  { %v73_v32 = vshrl.u32 %v69_v27, 8  ;;  %v70_v33 = vxor.u32 %v66_v28, %v62_v24  ;;  %v71_v34 = vxor.u32 %v67_v29, %v63_v25 }
  0x21   :  { %v72_v36 = vxor.u32 %v68_v31, %v64_v26 }
  0x22   :  { %vm79_vm0 = vcmp.lt.s32.totalorder %v73_v32, %v78_v30  ;;  %v74_v37 = vshrl.u32 %v70_v33, 8  ;;  %v75_v38 = vshrl.u32 %v71_v34, 8 }
  0x23   :  { %v120_v40 = vsel %vm79_vm0, 1.0, %v176_v39  ;;  %v76_v43 = vshrl.u32 %v72_v36, 8 }
  0x24   :  { %v95_v44 = vmul.f32 %v120_v40, %v83_v35  ;;  %vm80_vm1 = vcmp.lt.s32.totalorder %v74_v37, %v78_v30  ;;  %vm81_vm2 = vcmp.lt.s32.totalorder %v75_v38, %v78_v30 }
  0x25   :  { %v121_v46 = vsel %vm80_vm1, 1.0, %v176_v39  ;;  %v122_v47 = vsel %vm81_vm2, 1.0, %v176_v39  ;;  %vm82_vm3 = vcmp.lt.s32.totalorder %v76_v43, %v78_v30 }
  0x26   :  { %99 = vst [vmem:[#allocation7] sm:$0xff] %v95_v44  ;;  %v96_v48 = vmul.f32 %v121_v46, %v84_v41  ;;  %v97_v49 = vmul.f32 %v122_v47, %v85_v42  ;;  %v123_v50 = vsel %vm82_vm3, 1.0, %v176_v39 }
  0x27   :  { %v98_v51 = vmul.f32 %v123_v50, %v86_v45 }
  0x28   :  { %100 = vst [vmem:[#allocation7 + $0x8] sm:$0xff] %v96_v48  ;;  %101 = vst [vmem:[#allocation7 + $0x10] sm:$0xff] %v97_v49 }
  0x29   :  { %102 = vst [vmem:[#allocation7 + $0x18] sm:$0xff] %v98_v51 }
  0x2a   :  { %160 = shalt.err (!%p157_p9)
}
  0x2b   :  { %114 = dma.vmem_to_hbm [thread:$0]  %s109_s1, 512, %s219_s3, [#allocation6], %s174_s15, %s174_s15, %s175_s16  }
  0x2c   :  { %171 = dma.done.wait [#allocation6], 512  }
  0x2d   :  { %172 = vsyncadd [#allocation6], 4294966784 }
  0x2e   :  { %118 = vsyncpa [#allocation5], 1 }
  0x2f   :  { %119 = vsyncpa [#allocation6], 1 }

</bundles_post_ra>
